<compile_context>
chip_gen: v7x
topology: tpu7x:2x2x1
jax: 0.10.0
libtpu: 0.0.40
codegen_flags: <defaults>
</compile_context>

<pallas_src>
import jax
import jax.numpy as jnp
from jax.experimental import pallas as pl
from jax.experimental.pallas import tpu as pltpu


def _r8(v):
    return ((v + 7) // 8) * 8


def _r128(v):
    return ((v + 127) // 128) * 128


def _make_kernel(has_bias, compute_dtype):
    """Build the kernel body; bias handling is gated statically."""

    def body(x_ref, w_ref, b_ref, o_ref):
        # x_ref: (tb, tn, d_in)   w_ref: (tn, d_in, d_out)
        # b_ref: (tn, d_out)/None o_ref: (tb, tn, d_out)
        xv = x_ref[...]
        if compute_dtype is not None:
            xv = xv.astype(compute_dtype)            # narrow before the relayout
        x_t = pltpu.einshape("btk->tbk", xv)         # (tn, tb, d_in)
        acc = jnp.einsum("tbk,tko->tbo", x_t, w_ref[...],
                         preferred_element_type=jnp.float32)   # MXU, f32 accum
        if b_ref is not None:
            acc = acc + b_ref[...][:, None, :].astype(jnp.float32)
        out_t = acc.astype(o_ref.dtype)              # cast BEFORE output relayout
        o_ref[...] = pltpu.einshape("tbo->bto", out_t)

    if has_bias:
        def kernel(x_ref, w_ref, b_ref, o_ref):
            body(x_ref, w_ref, b_ref, o_ref)
    else:
        def kernel(x_ref, w_ref, o_ref):
            body(x_ref, w_ref, None, o_ref)
    return kernel


def nlinear(x, weight, bias=None, *, block_b=None, block_n=None,
            compute_dtype=None, vmem_limit_bytes=None):
    """x: (B, n, d_in), weight: (n, d_in, d_out), bias: (n, d_out) or None."""
    B, n, d_in = x.shape
    n_w, d_in_w, d_out = weight.shape
    assert (n, d_in) == (n_w, d_in_w)
    has_bias = bias is not None
    if has_bias:
        assert bias.shape == (n, d_out)
    out_dtype = jnp.result_type(x.dtype, weight.dtype)

    # ---- chip-aware VMEM budget -------------------------------------------
    try:
        vmem_cap = int(pltpu.get_tpu_info().vmem_capacity_bytes)
    except Exception:
        vmem_cap = 64 * 1024 * 1024                  # conservative (v7x-sized)
    if vmem_limit_bytes is None:
        # ~96 MiB on 128 MiB parts (v5e/v6e), ~48 MiB on 64 MiB parts (v7x).
        vmem_limit_bytes = min(96 * 1024 * 1024, (vmem_cap * 3) // 4)
    budget = int(vmem_limit_bytes * 0.85)            # headroom for the compiler

    isz_x = x.dtype.itemsize
    isz_w = weight.dtype.itemsize
    isz_o = jnp.dtype(out_dtype).itemsize
    isz_c = jnp.dtype(compute_dtype).itemsize if compute_dtype is not None else isz_x
    bias_isz = bias.dtype.itemsize if has_bias else 0

    def w_tile_bytes(tn_):
        wb = tn_ * _r8(d_in) * _r128(d_out) * isz_w
        bb = _r8(tn_) * _r128(d_out) * bias_isz if has_bias else 0
        return wb + bb

    def step_bytes(tb_, tn_):
        x_blk = tb_ * _r8(tn_) * _r128(d_in) * isz_x
        o_blk = tb_ * _r8(tn_) * _r128(d_out) * isz_o
        # einshape / accumulator temporaries are materialized VMEM copies.
        tmp = (tn_ * _r8(tb_) * _r128(d_in) * isz_c        # transposed x
               + tn_ * _r8(tb_) * _r128(d_out) * 4          # f32 accumulator
               + tn_ * _r8(tb_) * _r128(d_out) * isz_o * 2)  # cast + transposed out
        return 2 * (x_blk + o_blk) + 2 * w_tile_bytes(tn_) + tmp

    # ---- position tile: full axis if the weight tile fits VMEM -------------
    if block_n is not None and block_n < n:
        tn = max(8, (block_n // 8) * 8)
    else:
        tn = n
    while tn > 8 and 2 * w_tile_bytes(tn) > budget // 2:
        tn = max(8, ((tn // 2) // 8) * 8)
    if tn >= n:
        tn = n                                        # full axis -> no constraint

    # ---- batch tile: as large as the budget allows --------------------------
    if block_b is None:
        block_b = 512 if vmem_cap >= 96 * 1024 * 1024 else 256
    tb = max(1, min(block_b, B))
    while tb > 8 and step_bytes(tb, tn) > budget:
        tb = max(8, tb // 2)

    # Position OUTER, batch INNER: weight/bias index is constant across the
    # inner loop, so they are DMA'd once per position tile (once overall when
    # tn == n).  No padding: boundary blocks are masked by Pallas.
    grid = (pl.cdiv(n, tn), pl.cdiv(B, tb))

    kernel = _make_kernel(has_bias, compute_dtype)

    in_specs = [
        pl.BlockSpec((tb, tn, d_in), lambda ni, bi: (bi, ni, 0)),     # x
        pl.BlockSpec((tn, d_in, d_out), lambda ni, bi: (ni, 0, 0)),   # weight
    ]
    args = [x, weight]
    if has_bias:
        in_specs.append(pl.BlockSpec((tn, d_out), lambda ni, bi: (ni, 0)))
        args.append(bias)
    out_spec = pl.BlockSpec((tb, tn, d_out), lambda ni, bi: (bi, ni, 0))

    # Shard the position axis across cores when it has >= 2 tiles (each core
    # then owns a disjoint weight slice); otherwise shard on batch.
    dims = ("parallel", "arbitrary") if grid[0] >= 2 else ("arbitrary", "parallel")

    flops = 2 * B * n * d_in * d_out
    bytes_accessed = (x.size * isz_x + weight.size * isz_w
                      + (bias.size * bias_isz if has_bias else 0)
                      + B * n * d_out * isz_o)        # weight streamed exactly once

    out = pl.pallas_call(
        kernel,
        out_shape=jax.ShapeDtypeStruct((B, n, d_out), out_dtype),
        grid_spec=pltpu.PrefetchScalarGridSpec(
            num_scalar_prefetch=0,
            grid=grid,
            in_specs=in_specs,
            out_specs=out_spec,
        ),
        compiler_params=pltpu.CompilerParams(
            dimension_semantics=dims,
            vmem_limit_bytes=int(vmem_limit_bytes),
        ),
        cost_estimate=pl.CostEstimate(
            flops=flops, transcendentals=0, bytes_accessed=bytes_accessed),
    )(*args)
    return out


def init_nlinear_params(key, n, d_in, d_out, dtype=jnp.float32):
    # Mirrors nn.Linear's U(-1/sqrt(d_in), 1/sqrt(d_in)) init, weight stored
    # transposed (d_in, d_out) per position, exactly like the PyTorch module.
    kw, kb = jax.random.split(key)
    bound = 1.0 / jnp.sqrt(jnp.asarray(d_in, dtype))
    weight = jax.random.uniform(kw, (n, d_in, d_out), dtype, -bound, bound)
    bias = jax.random.uniform(kb, (n, d_out), dtype, -bound, bound)
    return weight, bias


if __name__ == "__main__":
    # Small but non-trivial shapes: 2-step batch grid, full-n weight residency.
    B, n, d_in, d_out = 16, 12, 32, 16

    key = jax.random.PRNGKey(0)
    kx, kp = jax.random.split(key)
    x = jax.random.normal(kx, (B, n, d_in), jnp.float32)
    weight, bias = init_nlinear_params(kp, n, d_in, d_out)

    out = nlinear(x, weight, bias, block_b=8)        # grid (1, 2), weight resident
    out = jax.block_until_ready(out)

    # Reference (pure JAX) check of the exact PyTorch semantics.
    ref = jnp.sum(x[..., None] * weight[None], axis=-2) + bias[None]
    assert out.shape == (B, n, d_out)
    assert jnp.allclose(out, ref, atol=1e-4, rtol=1e-4)

    # bias=None path (statically gated: no zero bias tensor is streamed).
    out_nb = jax.block_until_ready(nlinear(x, weight, None, block_b=8))
    ref_nb = jnp.sum(x[..., None] * weight[None], axis=-2)
    assert jnp.allclose(out_nb, ref_nb, atol=1e-4, rtol=1e-4)

    print("KERNEL_OK")
</pallas_src>

<mosaic_0001>
module attributes {stable_mosaic.version = 11 : i64} {
  func.func @kernel(%arg0: i32, %arg1: i32, %arg2: memref<8x12x32xf32, #tpu.memory_space<vmem>>, %arg3: memref<12x32x16xf32, #tpu.memory_space<vmem>>, %arg4: memref<12x16xf32, #tpu.memory_space<vmem>>, %arg5: memref<8x12x16xf32, #tpu.memory_space<vmem>>) attributes {dimension_semantics = [#tpu.dimension_semantics<arbitrary>, #tpu.dimension_semantics<parallel>], iteration_bounds = array<i64: 1, 2>, scalar_prefetch = 0 : i64, scratch_operands = 0 : i64, tpu.core_type = #tpu.core_type<tc>, window_params = [{transform_indices = @transform_0, window_bounds = array<i64: 8, 12, 32>}, {transform_indices = @transform_1, window_bounds = array<i64: 12, 32, 16>}, {transform_indices = @transform_2, window_bounds = array<i64: 12, 16>}, {transform_indices = @transform_3, window_bounds = array<i64: 8, 12, 16>}]} {
    %c0 = arith.constant 0 : index
    %c0_0 = arith.constant 0 : index
    %c0_1 = arith.constant 0 : index
    %0 = vector.load %arg2[%c0, %c0_0, %c0_1] : memref<8x12x32xf32, #tpu.memory_space<vmem>>, vector<8x12x32xf32>
    %1 = tpu.transpose %0, [1, 0, 2] : vector<8x12x32xf32> -> vector<12x8x32xf32>
    %c0_2 = arith.constant 0 : index
    %c0_3 = arith.constant 0 : index
    %c0_4 = arith.constant 0 : index
    %2 = vector.load %arg3[%c0_2, %c0_3, %c0_4] : memref<12x32x16xf32, #tpu.memory_space<vmem>>, vector<12x32x16xf32>
    "tpu.trace_start"() <{level = 10 : i32, message = "tbk,tko->tbo"}> : () -> ()
    %cst = arith.constant dense<0.000000e+00> : vector<12x8x16xf32>
    %3 = tpu.matmul %1, %2, %cst {dimension_numbers = #tpu.dot_dimension_numbers<[2], [1], [1], [2], [0, 0, 0, 1, 1, 2], [0], [0]>} : vector<12x8x32xf32>, vector<12x32x16xf32>, vector<12x8x16xf32> -> vector<12x8x16xf32>
    "tpu.trace_stop"() : () -> ()
    %c0_5 = arith.constant 0 : index
    %c0_6 = arith.constant 0 : index
    %4 = vector.load %arg4[%c0_5, %c0_6] : memref<12x16xf32, #tpu.memory_space<vmem>>, vector<12x16xf32>
    %5 = vector.shape_cast %4 : vector<12x16xf32> to vector<12x1x16xf32>
    %6 = vector.broadcast %5 : vector<12x1x16xf32> to vector<12x8x16xf32>
    %7 = arith.addf %3, %6 : vector<12x8x16xf32>
    %8 = tpu.transpose %7, [1, 0, 2] : vector<12x8x16xf32> -> vector<8x12x16xf32>
    %c0_7 = arith.constant 0 : index
    %c0_8 = arith.constant 0 : index
    %c0_9 = arith.constant 0 : index
    %9 = vector.load %arg5[%c0_7, %c0_8, %c0_9] : memref<8x12x16xf32, #tpu.memory_space<vmem>>, vector<8x12x16xf32>
    tpu.vector_store %arg5[%c0_7, %c0_8, %c0_9], %8 {strides = array<i32>} : memref<8x12x16xf32, #tpu.memory_space<vmem>>, vector<8x12x16xf32>,
    return
  }
  func.func @transform_0(%arg0: i32, %arg1: i32) -> (i32, i32, i32) {
    %c0_i32 = arith.constant 0 : i32
    %c0_i32_0 = arith.constant 0 : i32
    return %arg1, %arg0, %c0_i32 : i32, i32, i32
  }
  func.func @transform_1(%arg0: i32, %arg1: i32) -> (i32, i32, i32) {
    %c0_i32 = arith.constant 0 : i32
    %c0_i32_0 = arith.constant 0 : i32
    %c0_i32_1 = arith.constant 0 : i32
    return %arg0, %c0_i32, %c0_i32_0 : i32, i32, i32
  }
  func.func @transform_2(%arg0: i32, %arg1: i32) -> (i32, i32) {
    %c0_i32 = arith.constant 0 : i32
    %c0_i32_0 = arith.constant 0 : i32
    return %arg0, %c0_i32 : i32, i32
  }
  func.func @transform_3(%arg0: i32, %arg1: i32) -> (i32, i32, i32) {
    %c0_i32 = arith.constant 0 : i32
    %c0_i32_0 = arith.constant 0 : i32
    return %arg1, %arg0, %c0_i32 : i32, i32, i32
  }
}

</mosaic_0001>

<bundles_post_ra>
// kernel: tpu_custom_call.1
= control target key start
LH: loop header
LB: loop body
LE: loop exit
PB: predicated region body
PF: predicated region fallthrough
CT: control target
= control target key end

     0   :  { %s2264_s12 = smov 0   ;;  %s2266_s13 = smov 0   ;;  %s2675_s0 = inlined_call_operand.vmem [shape: f32[16,12,32], index: 0, kind: input, shape index: {}]   ;;  %s2676_s1 = inlined_call_operand.vmem [shape: f32[12,32,16], index: 1, kind: input, shape index: {}]   ;;  %s2677_s2 = inlined_call_operand.vmem [shape: f32[12,16], index: 2, kind: input, shape index: {}]   ;;  %s2678_s3 = inlined_call_operand.vmem [shape: f32[16,12,16], index: 3, kind: output, shape index: {}]  }
   0x1   :  { %s2268_s14 = smov 0  }
   0x2 LB: > { %s22_s15 = sadd.s32 1, %s2232_s13  ;;  %p1895_p0 = scmp.ge.s32.totalorder %s2236_s14, 1  ;;  %s2236_s14 = sphi %s2268_s14, %s13_s14   ;;  %s2232_s13 = sphi %s2266_s13, %s2680_s13   ;;  %s2228_s12 = sphi %s2264_s12, %s2679_s12  }
   0x3   : > { %p23_p1 = scmp.ge.s32.totalorder %s22_s15, 2  ;;  %p183_p2 = scmp.lt.s32.totalorder %s2236_s14, 3 }
   0x5   : > { %s2682_s15 = smov (%p23_p1, %s22_s15), 0  ;;  %p184_p3 = pnand %p1895_p0, %p183_p2 }
   0x6   : > { %v485_v0 = vld [vmem:[%s2676_s1] sm:$0xff] (!%p184_p3)  ;;  %v486_v1 = vld [vmem:[%s2676_s1 + $0x8] sm:$0xff] (!%p184_p3)  ;;  %v286_v3 = vlaneseq (!%p184_p3)  ;;  %v2238_v4 = vmov (!%p184_p3), 0.0|0.0   ;;  %v487_v7 = vld [vmem:[%s2676_s1 + $0x10] sm:$0xff] (!%p184_p3)  ;;  %s1896_s28 = sshll.u32 (!%p184_p3), %s2228_s12, 3  ;;  %vm2239_vm0 = vmmov (!%p184_p3), 0  }
   0x7   : > { %187 = sbr.rel (%p184_p3) target bundleno = 298 (0x12a), region = 32  ;;  %v489_v2 = vld [vmem:[%s2676_s1 + $0x20] sm:$0xff] (!%p184_p3)  ;;  %2111 = vmatprep.subr.bf16.mxu0 (!%p184_p3), %v2238_v4  ;;  %2117 = vmatprep.subr.bf16.mxu1 (!%p184_p3), %v2238_v4  ;;  %v2112_v5 = vpack.c.bf16 (!%p184_p3), %v486_v1, %v485_v0  ;;  %v490_v6 = vld [vmem:[%s2676_s1 + $0x28] sm:$0xff] (!%p184_p3)  ;;  %v488_v8 = vld [vmem:[%s2676_s1 + $0x18] sm:$0xff] (!%p184_p3)  ;;  %v2240_v12 = vmov (!%p184_p3), 0.0   ;;  %p230_p4 = scmp.lt.s32.totalorder (!%p184_p3), %s1896_s28, 15 }
   0x8   : > { %v2118_v9 = vpack.c.bf16 (!%p184_p3), %v490_v6, %v489_v2  ;;  %v491_v10 = vld [vmem:[%s2676_s1 + $0x30] sm:$0xff] (!%p184_p3)  ;;  %v492_v11 = vld [vmem:[%s2676_s1 + $0x38] sm:$0xff] (!%p184_p3)  ;;  %1987 = vmatprep.mubr.msk.f32.mxu0 (!%p184_p3), %vm2239_vm0, %v2240_v12  ;;  %1998 = vmatprep.mubr.msk.f32.mxu1 (!%p184_p3), %vm2239_vm0, %v2240_v12  ;;  %v2241_v13 = vmov (!%p184_p3), 1983009808   ;;  %v2115_v15 = vpack.c.bf16 (!%p184_p3), %v488_v8, %v487_v7  ;;  %v2315_v16 = vshrl.u32 (!%p184_p3), %v286_v3, 7  ;;  %v493_v41 = vld [vmem:[%s2676_s1 + $0x40] sm:$0xff] (!%p184_p3) }
   0x9   : > { %v284_v14 = vunpack.c.l.s4 (!%p184_p3), %v2241_v13  ;;  %2113 = vmatpush3.bf16.msra.mxu0 (!%p184_p3), %v2112_v5  ;;  %v2121_v17 = vpack.c.bf16 (!%p184_p3), %v492_v11, %v491_v10  ;;  %v2242_v19 = vmov (!%p184_p3), 1934713408   ;;  %v494_v44 = vld [vmem:[%s2676_s1 + $0x48] sm:$0xff] (!%p184_p3)  ;;  %v497_v45 = vld [vmem:[%s2676_s1 + $0x60] sm:$0xff] (!%p184_p3)  ;;  %vm670_vm1 = vcmask (!%p184_p3), 261120   ;;  %v495_v56 = vld [vmem:[%s2676_s1 + $0x50] sm:$0xff] (!%p184_p3) }
   0xa   : > { %2119 = vmatpush3.bf16.msra.mxu1 (!%p184_p3), %v2118_v9  ;;  %2114 = vmatprep.subr.bf16.mxu0 (!%p184_p3), %v2238_v4  ;;  %v348_v20 = vunpack.c.l.s4 (!%p184_p3), %v2242_v19  ;;  %v498_v46 = vld [vmem:[%s2676_s1 + $0x68] sm:$0xff] (!%p184_p3)  ;;  %v2124_v54 = vpack.c.bf16 (!%p184_p3), %v494_v44, %v493_v41  ;;  %v496_v59 = vld [vmem:[%s2676_s1 + $0x58] sm:$0xff] (!%p184_p3)  ;;  %v499_v60 = vld [vmem:[%s2676_s1 + $0x70] sm:$0xff] (!%p184_p3)  ;;  %vm1751_vm2 = vcmask (!%p184_p3), 130048   ;;  %vm1753_vm3 = vcmask (!%p184_p3), 125952  }
   0xb   : > { %v285_v18 = vunpack.c.0.s8 (!%p184_p3), %v284_v14  ;;  %2120 = vmatprep.subr.bf16.mxu1 (!%p184_p3), %v2238_v4  ;;  %v2130_v55 = vpack.c.bf16 (!%p184_p3), %v498_v46, %v497_v45  ;;  %v500_v61 = vld [vmem:[%s2676_s1 + $0x78] sm:$0xff] (!%p184_p3)  ;;  %v2127_v5 = vpack.c.bf16 (!%p184_p3), %v496_v59, %v495_v56  ;;  %v501_v7 = vld [vmem:[%s2676_s1 + $0x80] sm:$0xff] (!%p184_p3)  ;;  %v502_v8 = vld [vmem:[%s2676_s1 + $0x88] sm:$0xff] (!%p184_p3) }
   0xc   : > { %v349_v25 = vunpack.c.0.s8 (!%p184_p3), %v348_v20  ;;  %v2133_v6 = vpack.c.bf16 (!%p184_p3), %v500_v61, %v499_v60  ;;  %v505_v9 = vld [vmem:[%s2676_s1 + $0xa0] sm:$0xff] (!%p184_p3)  ;;  %v506_v10 = vld [vmem:[%s2676_s1 + $0xa8] sm:$0xff] (!%p184_p3)  ;;  %v503_v19 = vld [vmem:[%s2676_s1 + $0x90] sm:$0xff] (!%p184_p3) }
   0xd   : > { %2116 = vmatpush3.bf16.msra.mxu0 (!%p184_p3), %v2115_v15  ;;  %v2330_v21 = vsub.s32 (!%p184_p3), %v285_v18, %v2315_v16  ;;  %v2142_v18 = vpack.c.bf16 (!%p184_p3), %v506_v10, %v505_v9  ;;  %v504_v20 = vld [vmem:[%s2676_s1 + $0x98] sm:$0xff] (!%p184_p3)  ;;  %v519_v10 = vld [vmem:[%s2676_s1 + $0x110] sm:$0xff] (!%p184_p3) }
   0xe   : > { %s2684_s28 = smov (!%p230_p4, %s1896_s28), 15  ;;  %2122 = vmatpush3.bf16.msra.mxu1 %v2121_v17  ;;  %2123 = vmatprep.subr.bf16.mxu0 %v2238_v4  ;;  %v2345_v37 = vsub.s32 %v349_v25, %v2315_v16  ;;  %v2136_v17 = vpack.c.bf16 %v502_v8, %v501_v7 }
   0xf   : > { %s1917_s6 = sshll.u32 %s2684_s28, 4  ;;  %2129 = vmatprep.subr.bf16.mxu1 %v2238_v4 }
  0x10   : > { %s2327_s9 = scalar_lea.vmem %s2675_s0, %s1917_s6  ;;  %s2618_s8 = scalar_lea.vmem %s2678_s3, %s1917_s6 }
  0x11   : > { %v265_v22 = vld [vmem:[%s2327_s9] sm:$0xff]  ;;  %v267_v23 = vld [vmem:[%s2327_s9 + $0x10] sm:$0xff] }
  0x12   : > { %v269_v24 = vld [vmem:[%s2327_s9 + $0x20] sm:$0xff]  ;;  %v271_v26 = vld [vmem:[%s2327_s9 + $0x30] sm:$0xff] }
  0x13   : > { %v273_v27 = vld [vmem:[%s2327_s9 + $0x40] sm:$0xff]  ;;  %v275_v28 = vld [vmem:[%s2327_s9 + $0x50] sm:$0xff]  ;;  %v281_v29 = vcombine.low %v265_v22, %v269_v24  ;;  %v297_v32 = vcombine.low %v267_v23, %v271_v26  ;;  %v282_v42 = vcombine.high %v265_v22, %v269_v24  ;;  %v298_v47 = vcombine.high %v267_v23, %v271_v26  ;;  %v508_v23 = vld [vmem:[%s2676_s1 + $0xb8] sm:$0xff] }
  0x14   : > { %v277_v30 = vld [vmem:[%s2327_s9 + $0x60] sm:$0xff]  ;;  %v279_v31 = vld [vmem:[%s2327_s9 + $0x70] sm:$0xff]  ;;  %v266_v26 = vld [vmem:[%s2327_s9 + $0x8] sm:$0xf] }
  0x15   : > { %v289_v33 = vrot.slane %v281_v29, %v2330_v21  ;;  %v313_v34 = vcombine.low %v273_v27, %v277_v30  ;;  %v329_v35 = vcombine.low %v275_v28, %v279_v31  ;;  %v305_v36 = vrot.slane %v297_v32, %v2330_v21  ;;  %v507_v22 = vld [vmem:[%s2676_s1 + $0xb0] sm:$0xff]  ;;  %v270_v29 = vld [vmem:[%s2327_s9 + $0x28] sm:$0xf] }
  0x16   : > { %v314_v48 = vcombine.high %v273_v27, %v277_v30  ;;  %v330_v49 = vcombine.high %v275_v28, %v279_v31  ;;  %v2376_v62 = vrot.slane %v282_v42, %v2330_v21  ;;  %v2379_v63 = vrot.slane %v298_v47, %v2330_v21  ;;  %v268_v27 = vld [vmem:[%s2327_s9 + $0x18] sm:$0xf]  ;;  %v509_v28 = vld [vmem:[%s2676_s1 + $0xc0] sm:$0xff]  ;;  %v274_v31 = vld [vmem:[%s2327_s9 + $0x48] sm:$0xf] }
  0x17   : > { %v321_v38 = vrot.slane %v313_v34, %v2330_v21  ;;  %v337_v39 = vrot.slane %v329_v35, %v2330_v21  ;;  %v345_v40 = vcombine.low %v289_v33, %v305_v36  ;;  %v346_v51 = vcombine.high %v289_v33, %v305_v36  ;;  %v272_v30 = vld [vmem:[%s2327_s9 + $0x38] sm:$0xf]  ;;  %v278_v35 = vld [vmem:[%s2327_s9 + $0x68] sm:$0xf] }
  0x18   : > { %v2382_v0 = vrot.slane %v314_v48, %v2330_v21  ;;  %v2385_v1 = vrot.slane %v330_v49, %v2330_v21  ;;  %v361_v11 = vcombine.low %v2376_v62, %v2379_v63  ;;  %v2139_v32 = vpack.c.bf16 %v504_v20, %v503_v19  ;;  %v276_v34 = vld [vmem:[%s2327_s9 + $0x58] sm:$0xf]  ;;  %v525_v20 = vld [vmem:[%s2676_s1 + $0x140] sm:$0xff] }
  0x19   : > { %v377_v43 = vcombine.low %v321_v38, %v337_v39  ;;  %v353_v50 = vrot.slane %v345_v40, %v2345_v37  ;;  %v378_v52 = vcombine.high %v321_v38, %v337_v39  ;;  %v360_v2 = vrot.slane %v346_v51, %v2345_v37  ;;  %v280_v36 = vld [vmem:[%s2327_s9 + $0x78] sm:$0xf]  ;;  %v510_v38 = vld [vmem:[%s2676_s1 + $0xc8] sm:$0xff]  ;;  %v513_v39 = vld [vmem:[%s2676_s1 + $0xe0] sm:$0xff] }
  0x1a   : > { %v393_v13 = vcombine.low %v2382_v0, %v2385_v1  ;;  %v369_v24 = vrot.slane %v361_v11, %v2345_v37  ;;  %v2145_v33 = vpack.c.bf16 %v508_v23, %v507_v22  ;;  %v514_v40 = vld [vmem:[%s2676_s1 + $0xe8] sm:$0xff]  ;;  %v362_v41 = vcombine.high %v2376_v62, %v2379_v63  ;;  %v511_v51 = vld [vmem:[%s2676_s1 + $0xd0] sm:$0xff]  ;;  %v517_v63 = vld [vmem:[%s2676_s1 + $0x100] sm:$0xff] }
  0x1b   : > { %v385_v53 = vrot.slane %v377_v43, %v2345_v37  ;;  %v392_v3 = vrot.slane %v378_v52, %v2345_v37  ;;  %v394_v43 = vcombine.high %v2382_v0, %v2385_v1  ;;  %v417_v44 = vcombine.low %v266_v26, %v270_v29  ;;  %v512_v52 = vld [vmem:[%s2676_s1 + $0xd8] sm:$0xff]  ;;  %v518_v0 = vld [vmem:[%s2676_s1 + $0x108] sm:$0xff]  ;;  %v521_v1 = vld [vmem:[%s2676_s1 + $0x120] sm:$0xff] }
  0x1c   : > { %v401_v25 = vrot.slane %v393_v13, %v2345_v37  ;;  %v425_v46 = vcombine.low %v268_v27, %v272_v30  ;;  %v433_v47 = vcombine.low %v274_v31, %v278_v35  ;;  %v441_v48 = vcombine.low %v276_v34, %v280_v36  ;;  %v520_v11 = vld [vmem:[%s2676_s1 + $0x118] sm:$0xff]  ;;  %v523_v13 = vld [vmem:[%s2676_s1 + $0x130] sm:$0xff]  ;;  %v526_v22 = vld [vmem:[%s2676_s1 + $0x148] sm:$0xff] }
  0x1d   : > { %v409_v57 = vcombine.low %v353_v50, %v385_v53  ;;  %v410_v58 = vcombine.high %v353_v50, %v385_v53  ;;  %v411_v14 = vcombine.low %v360_v2, %v392_v3  ;;  %v412_v15 = vcombine.high %v360_v2, %v392_v3  ;;  %v515_v53 = vld [vmem:[%s2676_s1 + $0xf0] sm:$0xff]  ;;  %v522_v2 = vld [vmem:[%s2676_s1 + $0x128] sm:$0xff]  ;;  %v529_v23 = vld [vmem:[%s2676_s1 + $0x160] sm:$0xff] }
  0x1e   : > { %v413_v42 = vcombine.low %v369_v24, %v401_v25  ;;  %v414_v45 = vcombine.high %v369_v24, %v401_v25  ;;  %v2148_v49 = vpack.c.bf16 %v510_v38, %v509_v28  ;;  %v2154_v50 = vpack.c.bf16 %v514_v40, %v513_v39  ;;  %v530_v24 = vld [vmem:[%s2676_s1 + $0x168] sm:$0xff]  ;;  %v527_v31 = vld [vmem:[%s2676_s1 + $0x150] sm:$0xff]  ;;  %v532_v34 = vld [vmem:[%s2676_s1 + $0x178] sm:$0xff] }
  0x1f   : > { %1988 = vmatmul.mubr.msk.f32.vlgmr.msra.gmra.mrb[0].mxu0 %vm670_vm1, %v409_v57  ;;  %1999 = vmatmul.mubr.msk.f32.vlgmr.msra.gmra.mrb[0].mxu1 %vm670_vm1, %v410_v58  ;;  %v408_v56 = vrot.slane %v394_v43, %v2345_v37  ;;  %v2478_v57 = vrot.slane %v417_v44, %v2330_v21  ;;  %v432_v58 = vrot.slane %v425_v46, %v2330_v21 }
  0x20   : > { %2125 = vmatpush3.bf16.msra.mxu0 %v2124_v54  ;;  %2131 = vmatpush3.bf16.msra.mxu1 %v2130_v55  ;;  %v516_v54 = vld [vmem:[%s2676_s1 + $0xf8] sm:$0xff]  ;;  %v376_v55 = vrot.slane %v362_v41, %v2345_v37  ;;  %v440_v59 = vrot.slane %v433_v47, %v2330_v21  ;;  %v448_v60 = vrot.slane %v441_v48, %v2330_v21 }
  0x21   : > { %2126 = vmatprep.subr.bf16.mxu0 %v2238_v4  ;;  %2132 = vmatprep.subr.bf16.mxu1 %v2238_v4  ;;  %v2151_v61 = vpack.c.bf16 %v512_v52, %v511_v51  ;;  %v2157_v62 = vpack.c.bf16 %v516_v54, %v515_v53  ;;  %v2160_v8 = vpack.c.bf16 %v518_v0, %v517_v63 }
  0x22   : > { %2009 = vmatprep.mubr.msk.f32.mxu0 %vm2239_vm0, %v2240_v12  ;;  %2020 = vmatprep.mubr.msk.f32.mxu1 %vm2239_vm0, %v2240_v12  ;;  %v415_v3 = vcombine.low %v376_v55, %v408_v56  ;;  %v465_v7 = vcombine.low %v440_v59, %v448_v60  ;;  %v2166_v9 = vpack.c.bf16 %v522_v2, %v521_v1 }
  0x23   : > { %v450_v27 = vcombine.high %v2478_v57, %v432_v58  ;;  %v466_v28 = vcombine.high %v440_v59, %v448_v60  ;;  %v2172_v29 = vpack.c.bf16 %v526_v22, %v525_v20  ;;  %v2178_v30 = vpack.c.bf16 %v530_v24, %v529_v23 }
  0x24   : > { %2128 = vmatpush3.bf16.msra.mxu0 %v2127_v5  ;;  %2134 = vmatpush3.bf16.msra.mxu1 %v2133_v6  ;;  %v416_v5 = vcombine.high %v376_v55, %v408_v56  ;;  %v449_v6 = vcombine.low %v2478_v57, %v432_v58 }
  0x25   : > { %2135 = vmatprep.subr.bf16.mxu0 %v2238_v4  ;;  %2141 = vmatprep.subr.bf16.mxu1 %v2238_v4  ;;  %v464_v35 = vrot.slane %v450_v27, %v2345_v37  ;;  %v480_v36 = vrot.slane %v466_v28, %v2345_v37 }
  0x27   : > { %2010 = vmatmul.mubr.msk.f32.vlgmr.msra.gmra.mrb[2].mxu0 %vm670_vm1, %v411_v14  ;;  %2021 = vmatmul.mubr.msk.f32.vlgmr.msra.gmra.mrb[2].mxu1 %vm670_vm1, %v412_v15  ;;  %v524_v14 = vld [vmem:[%s2676_s1 + $0x138] sm:$0xff]  ;;  %v457_v15 = vrot.slane %v449_v6, %v2345_v37  ;;  %v483_v40 = vcombine.low %v464_v35, %v480_v36  ;;  %v484_v41 = vcombine.high %v464_v35, %v480_v36  ;;  %v1902_v35 = vld.sshfl [vmem:[%s2677_s2 + $0x8] sm:$0x33 pattern:$0x75316420] }
  0x28   : > { %2137 = vmatpush3.bf16.msra.mxu0 %v2136_v17  ;;  %2143 = vmatpush3.bf16.msra.mxu1 %v2142_v18  ;;  %v473_v17 = vrot.slane %v465_v7, %v2345_v37  ;;  %v2163_v18 = vpack.c.bf16 %v520_v11, %v519_v10  ;;  %v2169_v19 = vpack.c.bf16 %v524_v14, %v523_v13 }
  0x29   : > { %2138 = vmatprep.subr.bf16.mxu0 %v2238_v4  ;;  %2144 = vmatprep.subr.bf16.mxu1 %v2238_v4 }
  0x2a   : > { %2031 = vmatprep.mubr.msk.f32.mxu0 %vm2239_vm0, %v2240_v12  ;;  %2042 = vmatprep.mubr.msk.f32.mxu1 %vm2239_vm0, %v2240_v12  ;;  %v481_v25 = vcombine.low %v457_v15, %v473_v17  ;;  %v482_v26 = vcombine.high %v457_v15, %v473_v17 }
  0x2c   : > { %2140 = vmatpush3.bf16.msra.mxu0 %v2139_v32  ;;  %2146 = vmatpush3.bf16.msra.mxu1 %v2145_v33  ;;  %v528_v32 = vld [vmem:[%s2676_s1 + $0x158] sm:$0xff]  ;;  %v531_v33 = vld [vmem:[%s2676_s1 + $0x170] sm:$0xff] }
  0x2d   : > { %2147 = vmatprep.subr.bf16.mxu0 %v2238_v4  ;;  %2153 = vmatprep.subr.bf16.mxu1 %v2238_v4  ;;  %v2175_v38 = vpack.c.bf16 %v528_v32, %v527_v31  ;;  %v2181_v39 = vpack.c.bf16 %v532_v34, %v531_v33 }
  0x2f   : > { %2032 = vmatmul.mubr.msk.f32.vlgmr.msra.gmra.mrb[4].mxu0 %vm670_vm1, %v413_v42  ;;  %2043 = vmatmul.mubr.msk.f32.vlgmr.msra.gmra.mrb[4].mxu1 %vm670_vm1, %v414_v45  ;;  %v2243_v42 = vmov 1966171168  }
  0x30   : > { %2149 = vmatpush3.bf16.msra.mxu0 %v2148_v49  ;;  %2155 = vmatpush3.bf16.msra.mxu1 %v2154_v50  ;;  %v539_v43 = vunpack.c.l.s4 %v2243_v42  ;;  %v2576_v49 = vsub.s32 0, %v2315_v16 }
  0x31   : > { %2150 = vmatprep.subr.bf16.mxu0 %v2238_v4  ;;  %2156 = vmatprep.subr.bf16.mxu1 %v2238_v4 }
  0x32   : > { %2053 = vmatprep.mubr.msk.f32.mxu0 %vm2239_vm0, %v2240_v12  ;;  %2064 = vmatprep.mubr.msk.f32.mxu1 %vm2239_vm0, %v2240_v12  ;;  %v540_v44 = vunpack.c.0.s8 %v539_v43 }
  0x34   : > { %2152 = vmatpush3.bf16.msra.mxu0 %v2151_v61  ;;  %2158 = vmatpush3.bf16.msra.mxu1 %v2157_v62  ;;  %v2568_v45 = vsub.s32 %v540_v44, %v2315_v16 }
  0x35   : > { %2159 = vmatprep.subr.bf16.mxu0 %v2238_v4  ;;  %2165 = vmatprep.subr.bf16.mxu1 %v2238_v4 }
  0x37   : > { %2054 = vmatmul.mubr.msk.f32.vlgmr.msra.gmra.mrb[6].mxu0 %vm670_vm1, %v415_v3  ;;  %2065 = vmatmul.mubr.msk.f32.vlgmr.msra.gmra.mrb[6].mxu1 %vm670_vm1, %v416_v5 }
  0x38   : > { %2161 = vmatpush3.bf16.msra.mxu0 %v2160_v8  ;;  %2167 = vmatpush3.bf16.msra.mxu1 %v2166_v9 }
  0x39   : > { %2162 = vmatprep.subr.bf16.mxu0 %v2238_v4  ;;  %2168 = vmatprep.subr.bf16.mxu1 %v2238_v4 }
  0x3a   : > { %2075 = vmatprep.mubr.msk.f32.mxu0 %vm2239_vm0, %v2240_v12  ;;  %2086 = vmatprep.mubr.msk.f32.mxu1 %vm2239_vm0, %v2240_v12 }
  0x3c   : > { %2164 = vmatpush3.bf16.msra.mxu0 %v2163_v18  ;;  %2170 = vmatpush3.bf16.msra.mxu1 %v2169_v19 }
  0x3d   : > { %2171 = vmatprep.subr.bf16.mxu0 %v2238_v4  ;;  %2177 = vmatprep.subr.bf16.mxu1 %v2238_v4 }
  0x3f   : > { %2076 = vmatmul.mubr.msk.f32.vlgmr.msra.gmra.mrb[8].mxu0 %vm670_vm1, %v481_v25  ;;  %2087 = vmatmul.mubr.msk.f32.vlgmr.msra.gmra.mrb[8].mxu1 %vm670_vm1, %v482_v26 }
  0x40   : > { %2173 = vmatpush3.bf16.msra.mxu0 %v2172_v29  ;;  %2179 = vmatpush3.bf16.msra.mxu1 %v2178_v30 }
  0x41   : > { %2174 = vmatprep.subr.bf16.mxu0 %v2238_v4  ;;  %2180 = vmatprep.subr.bf16.mxu1 %v2238_v4  ;;  %v533_v4 = vld [vmem:[%s2677_s2] sm:$0xff] }
  0x42   : > { %2097 = vmatprep.mubr.msk.f32.mxu0 %vm2239_vm0, %v2240_v12  ;;  %2108 = vmatprep.mubr.msk.f32.mxu1 %vm2239_vm0, %v2240_v12  ;;  %v544_v46 = vrot.slane %v533_v4, %v2568_v45  ;;  %v537_v53 = vcombine.high %v533_v4, %v533_v4 }
  0x44   : > { %2176 = vmatpush3.bf16.msra.mxu0 %v2175_v38  ;;  %2182 = vmatpush3.bf16.msra.mxu1 %v2181_v39  ;;  %v552_v47 = vcombine.high %v544_v46, %v544_v46  ;;  %v560_v48 = vrot.slane %v544_v46, %v2568_v45  ;;  %v551_v62 = vrot.slane %v537_v53, %v2568_v45 }
  0x45   : > { %v593_v39 = vcombine.high %v1902_v35, %v1902_v35  ;;  %v600_v46 = vrot.slane %v1902_v35, %v2568_v45 }
  0x46   : > { %v574_v50 = vrot.slane %v552_v47, %v2568_v45  ;;  %v613_v51 = vrot.slane %v560_v48, %v2576_v49  ;;  %v582_v60 = vcombine.high %v560_v48, %v560_v48  ;;  %v553_v0 = vcombine.high %v551_v62, %v551_v62 }
  0x47   : > { %2098 = vmatmul.mubr.msk.f32.vlgmr.msra.gmra.mrb[10].mxu0 %vm670_vm1, %v483_v40  ;;  %2109 = vmatmul.mubr.msk.f32.vlgmr.msra.gmra.mrb[10].mxu1 %vm670_vm1, %v484_v41  ;;  %v567_v8 = vrot.slane %v551_v62, %v2568_v45  ;;  %v607_v47 = vrot.slane %v593_v39, %v2568_v45 }
  0x48   : > { %v617_v52 = vrot.slane %v574_v50, %v2576_v49  ;;  %v584_v61 = vcombine.high %v574_v50, %v574_v50  ;;  %v621_v16 = vrot.slane %v582_v60, %v2576_v49  ;;  %v581_v9 = vrot.slane %v553_v0, %v2568_v45 }
  0x49   : > { %v629_v20 = vrot.slane %v567_v8, %v2576_v49  ;;  %v583_v31 = vcombine.high %v567_v8, %v567_v8 }
  0x4a   : > { %v625_v63 = vrot.slane %v584_v61, %v2576_v49  ;;  %v633_v22 = vrot.slane %v581_v9, %v2576_v49  ;;  %v585_v32 = vcombine.high %v581_v9, %v581_v9 }
  0x4b   : > { %v637_v36 = vrot.slane %v583_v31, %v2576_v49 }
  0x4c   : > { %v641_v38 = vrot.slane %v585_v32, %v2576_v49 }
  0xf2   : > { %v740_v54 = vpop.f32.mrb[0].mxu0  ;;  %v813_v55 = vpop.f32.mrb[0].mxu1 }
  0xf3   : > { %v741_v56 = vadd.f32 %v740_v54, %v613_v51  ;;  %v814_v57 = vadd.f32 %v813_v55, %v617_v52  ;;  %v1989_v58 = vpop.f32.mrb[1].mxu0  ;;  %v2000_v59 = vpop.f32.mrb[1].mxu1 }
  0xf4   : > { %v649_v58 = vrot.slane %v607_v47, %v2576_v49 }
  0xfa   : > { %v886_v1 = vpop.f32.mrb[2].mxu0  ;;  %v959_v2 = vpop.f32.mrb[2].mxu1 }
  0xfb   : > { %v887_v3 = vadd.f32 %v886_v1, %v621_v16  ;;  %v960_v5 = vadd.f32 %v959_v2, %v625_v63  ;;  %v2011_v6 = vpop.f32.mrb[3].mxu0  ;;  %v2022_v7 = vpop.f32.mrb[3].mxu1  ;;  %v608_v1 = vcombine.high %v600_v46, %v600_v46  ;;  %v609_v2 = vcombine.high %v607_v47, %v607_v47 }
  0xfd   : > { %v1547_v10 = vcombine.low %v741_v56, %v887_v3  ;;  %v1548_v11 = vcombine.high %v741_v56, %v887_v3  ;;  %v1563_v13 = vcombine.low %v814_v57, %v960_v5  ;;  %v1564_v14 = vcombine.high %v814_v57, %v960_v5 }
  0xfe   : > { %v645_v57 = vrot.slane %v600_v46, %v2576_v49 }
  0xff   : > { %v1555_v15 = vrot.slane %v1547_v10, %v2330_v21  ;;  %v1562_v17 = vrot.slane %v1548_v11, %v2330_v21  ;;  %v1571_v18 = vrot.slane %v1563_v13, %v2330_v21  ;;  %v1578_v19 = vrot.slane %v1564_v14, %v2330_v21 }
 0x101   : > { %v1611_v23 = vcombine.low %v1555_v15, %v1571_v18  ;;  %v1612_v24 = vcombine.high %v1555_v15, %v1571_v18  ;;  %v1627_v25 = vcombine.low %v1562_v17, %v1578_v19  ;;  %v1628_v26 = vcombine.high %v1562_v17, %v1578_v19 }
 0x102   : > { %v1032_v27 = vpop.f32.mrb[4].mxu0  ;;  %v1105_v28 = vpop.f32.mrb[4].mxu1 }
 0x103   : > { %v2033_v29 = vpop.f32.mrb[5].mxu0  ;;  %v2044_v30 = vpop.f32.mrb[5].mxu1  ;;  %v1033_v33 = vadd.f32 %v1032_v27, %v629_v20  ;;  %v1106_v34 = vadd.f32 %v1105_v28, %v633_v22  ;;  %v1619_v62 = vrot.slane %v1611_v23, %v2345_v37  ;;  %v1626_v16 = vrot.slane %v1612_v24, %v2345_v37 }
 0x104   : > { %v1635_v10 = vrot.slane %v1627_v25, %v2345_v37  ;;  %v1642_v11 = vrot.slane %v1628_v26, %v2345_v37  ;;  %v653_v25 = vrot.slane %v608_v1, %v2576_v49  ;;  %v657_v26 = vrot.slane %v609_v2, %v2576_v49 }
 0x10a   : > { %v1178_v40 = vpop.f32.mrb[6].mxu0  ;;  %v1251_v41 = vpop.f32.mrb[6].mxu1 }
 0x10b   : > { %v1179_v42 = vadd.f32 %v1178_v40, %v637_v36  ;;  %v1252_v43 = vadd.f32 %v1251_v41, %v641_v38  ;;  %v2055_v44 = vpop.f32.mrb[7].mxu0  ;;  %v2066_v4 = vpop.f32.mrb[7].mxu1 }
 0x10d   : > { %v1579_v48 = vcombine.low %v1033_v33, %v1179_v42  ;;  %v1580_v50 = vcombine.high %v1033_v33, %v1179_v42  ;;  %v1595_v51 = vcombine.low %v1106_v34, %v1252_v43  ;;  %v1596_v52 = vcombine.high %v1106_v34, %v1252_v43 }
 0x10f   : > { %v1587_v53 = vrot.slane %v1579_v48, %v2330_v21  ;;  %v1594_v54 = vrot.slane %v1580_v50, %v2330_v21  ;;  %v1603_v55 = vrot.slane %v1595_v51, %v2330_v21  ;;  %v1610_v56 = vrot.slane %v1596_v52, %v2330_v21 }
 0x111   : > { %v1643_v59 = vcombine.low %v1587_v53, %v1603_v55  ;;  %v1644_v60 = vcombine.high %v1587_v53, %v1603_v55  ;;  %v1659_v45 = vcombine.low %v1594_v54, %v1610_v56  ;;  %v1660_v61 = vcombine.high %v1594_v54, %v1610_v56 }
 0x112   : > { %v1324_v63 = vpop.f32.mrb[8].mxu0  ;;  %v1397_v0 = vpop.f32.mrb[8].mxu1 }
 0x113   : > { %v1651_v3 = vrot.slane %v1643_v59, %v2345_v37  ;;  %v1658_v5 = vrot.slane %v1644_v60, %v2345_v37  ;;  %v1667_v6 = vrot.slane %v1659_v45, %v2345_v37  ;;  %v1674_v7 = vrot.slane %v1660_v61, %v2345_v37  ;;  %v2077_v8 = vpop.f32.mrb[9].mxu0  ;;  %v2088_v9 = vpop.f32.mrb[9].mxu1 }
 0x114   : > { %v1325_v13 = vadd.f32 %v1324_v63, %v645_v57  ;;  %v1398_v14 = vadd.f32 %v1397_v0, %v649_v58 }
 0x115   : > { %v1675_v15 = vcombine.low %v1619_v62, %v1651_v3  ;;  %v1676_v17 = vcombine.high %v1619_v62, %v1651_v3  ;;  %v1677_v18 = vcombine.low %v1626_v16, %v1658_v5  ;;  %v1678_v19 = vcombine.high %v1626_v16, %v1658_v5 }
 0x116   : > { %v1679_v20 = vcombine.low %v1635_v10, %v1667_v6  ;;  %v1680_v22 = vcombine.high %v1635_v10, %v1667_v6  ;;  %v1681_v23 = vcombine.low %v1642_v11, %v1674_v7  ;;  %v1682_v24 = vcombine.high %v1642_v11, %v1674_v7 }
 0x117   : > { %1752 = vst.msk [vmem:[%s2618_s8] sm:$0xff] %vm1751_vm2, %v1675_v15  ;;  %1755 = vst.msk [vmem:[%s2618_s8 + $0x10] sm:$0xff] %vm1751_vm2, %v1676_v17 }
 0x118   : > { %1757 = vst.msk [vmem:[%s2618_s8 + $0x20] sm:$0xff] %vm1751_vm2, %v1677_v18  ;;  %1759 = vst.msk [vmem:[%s2618_s8 + $0x30] sm:$0xff] %vm1751_vm2, %v1678_v19 }
 0x119   : > { %1761 = vst.msk [vmem:[%s2618_s8 + $0x40] sm:$0xff] %vm1751_vm2, %v1679_v20  ;;  %1763 = vst.msk [vmem:[%s2618_s8 + $0x50] sm:$0xff] %vm1751_vm2, %v1680_v22 }
 0x11a   : > { %1765 = vst.msk [vmem:[%s2618_s8 + $0x60] sm:$0xff] %vm1751_vm2, %v1681_v23  ;;  %1767 = vst.msk [vmem:[%s2618_s8 + $0x70] sm:$0xff] %vm1751_vm2, %v1682_v24  ;;  %v1470_v27 = vpop.f32.mrb[10].mxu0  ;;  %v1543_v28 = vpop.f32.mrb[10].mxu1 }
 0x11b   : > { %v1471_v29 = vadd.f32 %v1470_v27, %v653_v25  ;;  %v1544_v30 = vadd.f32 %v1543_v28, %v657_v26  ;;  %v2099_v31 = vpop.f32.mrb[11].mxu0  ;;  %v2110_v32 = vpop.f32.mrb[11].mxu1 }
 0x11d   : > { %v1683_v33 = vcombine.low %v1325_v13, %v1471_v29  ;;  %v1684_v34 = vcombine.high %v1325_v13, %v1471_v29  ;;  %v1699_v35 = vcombine.low %v1398_v14, %v1544_v30  ;;  %v1700_v36 = vcombine.high %v1398_v14, %v1544_v30 }
 0x11f   : > { %v1691_v49 = vrot.slane %v1683_v33, %v2330_v21  ;;  %v1698_v38 = vrot.slane %v1684_v34, %v2330_v21  ;;  %v1707_v39 = vrot.slane %v1699_v35, %v2330_v21  ;;  %v1714_v40 = vrot.slane %v1700_v36, %v2330_v21 }
 0x121   : > { %v1715_v41 = vcombine.low %v1691_v49, %v1707_v39  ;;  %v1716_v42 = vcombine.high %v1691_v49, %v1707_v39  ;;  %v1731_v43 = vcombine.low %v1698_v38, %v1714_v40  ;;  %v1732_v44 = vcombine.high %v1698_v38, %v1714_v40 }
 0x123   : > { %v1723_v4 = vrot.slane %v1715_v41, %v2345_v37  ;;  %v1730_v46 = vrot.slane %v1716_v42, %v2345_v37  ;;  %v1739_v47 = vrot.slane %v1731_v43, %v2345_v37  ;;  %v1746_v48 = vrot.slane %v1732_v44, %v2345_v37 }
 0x125   : > { %v1747_v21 = vcombine.high %v1723_v4, %v2240_v12  ;;  %v1748_v50 = vcombine.high %v1730_v46, %v2240_v12  ;;  %v1749_v51 = vcombine.high %v1739_v47, %v2240_v12  ;;  %v1750_v52 = vcombine.high %v1746_v48, %v2240_v12  ;;  %1754 = vst.msk [vmem:[%s2618_s8 + $0x8] sm:$0xf] %vm1753_vm3, %v1723_v4 }
 0x126   : > { %1758 = vst.msk [vmem:[%s2618_s8 + $0x28] sm:$0xf] %vm1753_vm3, %v1730_v46  ;;  %1762 = vst.msk [vmem:[%s2618_s8 + $0x48] sm:$0xf] %vm1753_vm3, %v1739_v47 }
 0x127   : > { %1766 = vst.msk [vmem:[%s2618_s8 + $0x68] sm:$0xf] %vm1753_vm3, %v1746_v48  ;;  %1756 = vst.msk [vmem:[%s2618_s8 + $0x18] sm:$0xf] %vm1753_vm3, %v1747_v21 }
 0x128   : > { %1760 = vst.msk [vmem:[%s2618_s8 + $0x38] sm:$0xf] %vm1753_vm3, %v1748_v50  ;;  %1764 = vst.msk [vmem:[%s2618_s8 + $0x58] sm:$0xf] %vm1753_vm3, %v1749_v51 }
 0x129   : > { %1768 = vst.msk [vmem:[%s2618_s8 + $0x78] sm:$0xf] %vm1753_vm3, %v1750_v52 }
 0x12a PF: > { %s13_s14 = sadd.s32 1, %s2236_s14   ;;  %s2679_s12 = smov %s2232_s13 }
 0x12b   : > { %p10_p5 = scmp.ge.s32.totalorder %s13_s14, 4   ;;  %s2680_s13 = smov %s2682_s15 }
 0x12d   :  { %12 = sbr.rel (!%p10_p5) target bundleno = 2 (0x2), region = 68 }

</bundles_post_ra>
